<compile_context>
chip_gen: v5e
topology: v5e:2x2
jax: 0.10.0
libtpu: 0.0.40
codegen_flags: <defaults>
</compile_context>

<pallas_src>
import jax
import jax.numpy as jnp
from jax.experimental import pallas as pl
from jax.experimental.pallas import tpu as pltpu

_LANE = 128     # vreg lane width
_SUBLANE = 8    # f32 sublane count


def linear_kernel(w_ref, b_ref, x_ref, o_ref):
    # w_ref: (1, 1) scalar in SMEM, b_ref: (1,) scalar in SMEM,
    # x_ref / o_ref: (block_rows, 128) lane-dense f32 tiles in VMEM.
    w = w_ref[0, 0]
    b = b_ref[0]
    o_ref[...] = x_ref[...] * w + b


def simple_model_forward(x, weight, bias, *, max_block_rows=512):
    """x: (B, 1) f32, weight: (1, 1) f32 (PyTorch out_feat x in_feat), bias: (1,) f32."""
    B, F = x.shape
    assert F == 1 and weight.shape == (1, 1) and bias.shape == (1,)

    # Choose a lane-dense block: (block_rows, 128) f32.  Small B -> one block;
    # large B -> max_block_rows rows per block (256 KiB/buffer at 512 rows).
    rows_needed = pl.cdiv(B, _LANE)
    if rows_needed <= max_block_rows:
        block_rows = max(
            _SUBLANE, ((rows_needed + _SUBLANE - 1) // _SUBLANE) * _SUBLANE
        )
    else:
        block_rows = max_block_rows

    chunk = block_rows * _LANE
    padded = ((B + chunk - 1) // chunk) * chunk
    rows = padded // _LANE
    grid = rows // block_rows

    # Free, contiguous reshape (B, 1) -> (rows, 128) lane-dense slab.
    x_flat = jnp.ravel(x)
    if padded != B:
        x_flat = jnp.pad(x_flat, (0, padded - B))
    x2d = x_flat.reshape(rows, _LANE)

    y2d = pl.pallas_call(
        linear_kernel,
        out_shape=jax.ShapeDtypeStruct((rows, _LANE), x.dtype),
        grid=(grid,),
        in_specs=[
            pl.BlockSpec(memory_space=pltpu.SMEM),                 # weight scalar
            pl.BlockSpec(memory_space=pltpu.SMEM),                 # bias scalar
            pl.BlockSpec((block_rows, _LANE), lambda i: (i, 0)),   # x tile (VMEM)
        ],
        out_specs=pl.BlockSpec((block_rows, _LANE), lambda i: (i, 0)),
        compiler_params=pltpu.CompilerParams(
            dimension_semantics=("parallel",)),
    )(weight, bias, x2d)

    # Trim padding and restore the (B, 1) view.
    return y2d.reshape(padded, 1)[:B]


if __name__ == "__main__":
    key = jax.random.PRNGKey(0)
    k_x, k_w, k_b = jax.random.split(key, 3)

    # Deterministic parameter init mimicking nn.Linear(1, 1):
    # uniform(-1/sqrt(fan_in), 1/sqrt(fan_in)) with fan_in = 1.
    weight = jax.random.uniform(k_w, (1, 1), minval=-1.0, maxval=1.0,
                                dtype=jnp.float32)
    bias = jax.random.uniform(k_b, (1,), minval=-1.0, maxval=1.0,
                              dtype=jnp.float32)

    # Small primary case (single block, padding/trim path).
    batch = 8
    x = jax.random.normal(k_x, (batch, 1), dtype=jnp.float32)
    y = simple_model_forward(x, weight, bias)
    jax.block_until_ready(y)
    y_ref = x @ weight.T + bias
    assert y.shape == (batch, 1)
    assert jnp.allclose(y, y_ref, atol=1e-6), "mismatch vs reference (small batch)"

    # Second case exercising the multi-step grid (>1 grid step forced by a
    # small block_rows) plus padding/trim.
    batch2 = 2050
    x2 = jax.random.normal(k_x, (batch2, 1), dtype=jnp.float32)
    y2 = simple_model_forward(x2, weight, bias, max_block_rows=8)
    jax.block_until_ready(y2)
    y2_ref = x2 @ weight.T + bias
    assert y2.shape == (batch2, 1)
    assert jnp.allclose(y2, y2_ref, atol=1e-6), "mismatch vs reference (gridded batch)"

    print("KERNEL_OK")
</pallas_src>

<mosaic_0001>
module attributes {stable_mosaic.version = 11 : i64} {
  func.func @linear_kernel(%arg0: i32, %arg1: memref<1x1xf32, #tpu.memory_space<smem>>, %arg2: memref<1xf32, #tpu.memory_space<smem>>, %arg3: memref<8x128xf32, #tpu.memory_space<vmem>>, %arg4: memref<8x128xf32, #tpu.memory_space<vmem>>) attributes {dimension_semantics = [#tpu.dimension_semantics<parallel>], iteration_bounds = array<i64: 1>, scalar_prefetch = 0 : i64, scratch_operands = 0 : i64, tpu.core_type = #tpu.core_type<tc>, window_params = [{transform_indices = @transform_0, window_bounds = array<i64: 1, 1>}, {transform_indices = @transform_1, window_bounds = array<i64: 1>}, {transform_indices = @transform_2, window_bounds = array<i64: 8, 128>}, {transform_indices = @transform_3, window_bounds = array<i64: 8, 128>}]} {
    %c0 = arith.constant 0 : index
    %c0_0 = arith.constant 0 : index
    %0 = memref.load %arg1[%c0, %c0_0] : memref<1x1xf32, #tpu.memory_space<smem>>
    %c0_1 = arith.constant 0 : index
    %1 = memref.load %arg2[%c0_1] : memref<1xf32, #tpu.memory_space<smem>>
    %c0_2 = arith.constant 0 : index
    %c0_3 = arith.constant 0 : index
    %2 = vector.load %arg3[%c0_2, %c0_3] : memref<8x128xf32, #tpu.memory_space<vmem>>, vector<8x128xf32>
    %3 = vector.broadcast %0 : f32 to vector<8x128xf32>
    %4 = arith.mulf %2, %3 : vector<8x128xf32>
    %5 = vector.broadcast %1 : f32 to vector<8x128xf32>
    %6 = arith.addf %4, %5 : vector<8x128xf32>
    %c0_4 = arith.constant 0 : index
    %c0_5 = arith.constant 0 : index
    %7 = vector.load %arg4[%c0_4, %c0_5] : memref<8x128xf32, #tpu.memory_space<vmem>>, vector<8x128xf32>
    tpu.vector_store %arg4[%c0_4, %c0_5], %6 {strides = array<i32>} : memref<8x128xf32, #tpu.memory_space<vmem>>, vector<8x128xf32>,
    return
  }
  func.func @transform_0(%arg0: i32) -> (i32, i32) {
    %c0_i32 = arith.constant 0 : i32
    %c0_i32_0 = arith.constant 0 : i32
    %c0_i32_1 = arith.constant 0 : i32
    return %c0_i32, %c0_i32_0 : i32, i32
  }
  func.func @transform_1(%arg0: i32) -> i32 {
    %c0_i32 = arith.constant 0 : i32
    %c0_i32_0 = arith.constant 0 : i32
    return %c0_i32 : i32
  }
  func.func @transform_2(%arg0: i32) -> (i32, i32) {
    %c0_i32 = arith.constant 0 : i32
    %c0_i32_0 = arith.constant 0 : i32
    return %arg0, %c0_i32 : i32, i32
  }
  func.func @transform_3(%arg0: i32) -> (i32, i32) {
    %c0_i32 = arith.constant 0 : i32
    %c0_i32_0 = arith.constant 0 : i32
    return %arg0, %c0_i32 : i32, i32
  }
}

</mosaic_0001>

<bundles_post_ra>
// kernel: tpu_custom_call.1
= control target key start
LH: loop header
LB: loop body
LE: loop exit
PB: predicated region body
PF: predicated region fallthrough
CT: control target
= control target key end

     0   :  { %10 = vsyncpa [#allocation5], 0  ;;  %s144_s0 = inlined_call_operand.<no memory space> [shape: f32[1,1], index: 0, kind: input, shape index: {}]   ;;  %s145_s1 = inlined_call_operand.<no memory space> [shape: f32[1], index: 1, kind: input, shape index: {}]   ;;  %s146_s2 = inlined_call_operand.hbm [shape: f32[8,128], index: 2, kind: input, shape index: {}]   ;;  %s147_s3 = inlined_call_operand.hbm [shape: f32[8,128], index: 3, kind: output, shape index: {}]  }
   0x1   :  { %11 = vsyncpa [#allocation6], 0  ;;  %s21_s14 = sshll.u32 %s146_s2, 4  ;;  %s110_s15 = smov [#allocation4]   ;;  %s22_s14 = int_to_ptr.hbm [resolvable:$true] %s21_s14 }
   0x2   :  { %s23_s16 = sshll.u32 %s110_s15, 4  ;;  %s24_s16 = int_to_ptr.vmem [resolvable:$true] %s23_s16 }
   0x3   :  { %26 = dma.hbm_to_vmem [thread:$0]  %s22_s14, 128, %s24_s16, [#allocation5]  }
   0x4   :  { %106 = dma.done.wait [#allocation5], 128  }
   0x5   :  { %107 = vsyncadd [#allocation5], 4294967168  ;;  %v34_v0 = vstv %s144_s0  ;;  %v33_v1 = vld [vmem:[#allocation4] sm:$0xff]  ;;  %v36_v2 = vstv %s145_s1  ;;  %s111_s21 = smov [#allocation7]   ;;  %s46_s24 = sshll.u32 %s147_s3, 4  ;;  %s47_s24 = int_to_ptr.hbm [resolvable:$true] %s46_s24 }
   0x6   :  { %s44_s22 = sshll.u32 %s111_s21, 4  ;;  %v35_v3 = vmul.f32 %v34_v0, %v33_v1  ;;  %s45_s22 = int_to_ptr.vmem [resolvable:$true] %s44_s22 }
   0x8   :  { %v37_v4 = vadd.f32 %v36_v2, %v35_v3 }
   0xa   :  { %38 = vst [vmem:[#allocation7] sm:$0xff] %v37_v4 }
   0xb   :  { %49 = dma.vmem_to_hbm [thread:$0]  %s45_s22, 128, %s47_s24, [#allocation6]  }
   0xc   :  { %108 = dma.done.wait [#allocation6], 128  }
   0xd   :  { %109 = vsyncadd [#allocation6], 4294967168 }
   0xe   :  { %54 = vsyncpa [#allocation5], 1 }
   0xf   :  { %55 = vsyncpa [#allocation6], 1 }

</bundles_post_ra>
